<compile_context>
chip_gen: v6e
topology: v6e:2x2x1
jax: 0.10.0
libtpu: 0.0.40
codegen_flags: <defaults>
</compile_context>

<pallas_src>
import jax
import jax.numpy as jnp
from jax.experimental import pallas as pl
from jax.experimental.pallas import tpu as pltpu


# -----------------------------------------------------------------------------
# Buffer construction (matches the PyTorch __init__).
# -----------------------------------------------------------------------------
def make_sinusoidal_encoding(d_model: int, max_len: int) -> jnp.ndarray:
    pos = jnp.arange(max_len, dtype=jnp.float32)[:, None]                      # [L, 1]
    denom = jnp.power(
        10000.0, jnp.arange(0, d_model, 2, dtype=jnp.float32) / d_model)       # [ceil(D/2)]
    angles = pos / denom                                                        # [L, ceil(D/2)]
    enc = jnp.zeros((max_len, d_model), dtype=jnp.float32)
    enc = enc.at[:, 0::2].set(jnp.sin(angles))
    # Guard odd d_model (the raw PyTorch code would shape-error there).
    enc = enc.at[:, 1::2].set(jnp.cos(angles[:, : d_model // 2]))
    return enc                                                                  # [L, D]


# -----------------------------------------------------------------------------
# Kernel: one elementwise add per tile.  Works for both layouts:
#   layout A: x_ref (tile_r, D)   enc_ref (tile_r, D)   -> same-rank add
#   layout B: x_ref (B, tile_c)   enc_ref (1, tile_c)   -> cheap sublane bcast
# -----------------------------------------------------------------------------
def _pos_enc_kernel(x_ref, enc_ref, o_ref):
    o_ref[...] = x_ref[...] + enc_ref[...]


def _vmem_budgets():
    """(per-step tile budget, scoped VMEM limit) gated on the chip's VMEM."""
    try:
        cap = pltpu.get_tpu_info().vmem_capacity_bytes
    except Exception:
        cap = 64 * 1024 * 1024  # conservative default
    if cap >= 96 * 1024 * 1024:          # v5e / v6e: 128 MiB physical
        return 32 * 1024 * 1024, 64 * 1024 * 1024
    return 16 * 1024 * 1024, 32 * 1024 * 1024   # v7x (64 MiB) / unknown


def _largest_divisor_leq(n: int, cap: int, multiple_of: int = 1) -> int:
    """Largest divisor of n that is <= cap, preferring multiples of
    `multiple_of` (hardware-friendly sublane/lane counts)."""
    cap = max(1, min(n, cap))
    best_any, best_pref = 1, 0
    d = 1
    while d * d <= n:
        if n % d == 0:
            for v in (d, n // d):
                if v <= cap:
                    best_any = max(best_any, v)
                    if v % multiple_of == 0:
                        best_pref = max(best_pref, v)
        d += 1
    return best_pref if best_pref > 0 else best_any


def positional_encoding_forward(x: jnp.ndarray, encoding: jnp.ndarray) -> jnp.ndarray:
    """x: [B, S, D]; encoding: [max_len, D] buffer (any float dtype)."""
    B, S, D = x.shape
    itemsize = jnp.dtype(x.dtype).itemsize
    # Slice + dtype-match in the wrapper: in-kernel add stays in x's native
    # dtype (no VPU casts, half the enc DMA bytes for bf16 activations).
    enc = encoding[:S, :].astype(x.dtype)                                       # [S, D]

    tile_budget, vmem_limit = _vmem_budgets()
    cost = pl.CostEstimate(
        flops=B * S * D,
        transcendentals=0,
        bytes_accessed=(2 * B * S * D + S * D) * itemsize,
    )

    # Dtype-aware sublane packing: 8 rows f32, 16 bf16, 32 int8/fp8.
    sub = 8 * max(1, 4 // itemsize)

    if D % 128 == 0 and S % sub == 0:
        # ---- Layout A: (B*S, D) row tiles, 2-D grid, enc fetched once -------
        # ~6 live (tile_r, D) VMEM tiles: x(2) + out(2) + enc(2, rarely swapped).
        max_rows = max(sub, tile_budget // (6 * D * itemsize))
        cap = min(max_rows, 2048)
        if S >= 2 * sub:
            cap = min(cap, S // 2)      # keep >= 2 seq tiles for v7x megacore
        cap = max(cap, sub)
        tile_r = _largest_divisor_leq(S, cap, multiple_of=sub)
        n_seq_tiles = S // tile_r

        x2 = x.reshape(B * S, D)        # free, contiguous reshape

        out = pl.pallas_call(
            _pos_enc_kernel,
            out_shape=jax.ShapeDtypeStruct((B * S, D), x.dtype),
            grid=(n_seq_tiles, B),      # batch innermost -> enc block index
                                        # constant across inner loop -> no re-DMA
            in_specs=[
                pl.BlockSpec((tile_r, D), lambda s, b: (b * n_seq_tiles + s, 0)),
                pl.BlockSpec((tile_r, D), lambda s, b: (s, 0)),
            ],
            out_specs=pl.BlockSpec((tile_r, D), lambda s, b: (b * n_seq_tiles + s, 0)),
            compiler_params=pltpu.CompilerParams(
                dimension_semantics=("parallel", "parallel"),
                vmem_limit_bytes=vmem_limit,
            ),
            cost_estimate=cost,
        )(x2, enc)
        return out.reshape(B, S, D)

    # ---- Layout B: D not 128-aligned or S not sublane-aligned ---------------
    # Fold seq*dim into the lane axis so stores are lane-dense: x -> (B, S*D),
    # enc -> (1, S*D).  enc is streamed exactly once (index changes per tile),
    # so this path is already at minimal HBM traffic.
    cols = S * D
    x2 = x.reshape(B, cols)
    enc2 = enc.reshape(1, cols)
    rows_pad = ((B + 7) // 8) * 8       # sublane padding of the B-row tiles
    per_col_bytes = (4 * rows_pad + 2 * 8) * itemsize   # x(2)+out(2)+enc(2)
    max_cols = max(128, tile_budget // per_col_bytes)

    if cols % 128 == 0:
        tile_c = _largest_divisor_leq(cols, max_cols, multiple_of=128)
        n_tiles = cols // tile_c
    elif per_col_bytes * cols <= tile_budget:
        tile_c = cols                   # full-dim block: (8,128) rule exempt
        n_tiles = 1
    else:
        tile_c = max(128, (max_cols // 128) * 128)
        n_tiles = pl.cdiv(cols, tile_c)  # padded edge tile; writes are masked

    out = pl.pallas_call(
        _pos_enc_kernel,
        out_shape=jax.ShapeDtypeStruct((B, cols), x.dtype),
        grid=(n_tiles,),
        in_specs=[
            pl.BlockSpec((B, tile_c), lambda c: (0, c)),
            pl.BlockSpec((1, tile_c), lambda c: (0, c)),
        ],
        out_specs=pl.BlockSpec((B, tile_c), lambda c: (0, c)),
        compiler_params=pltpu.CompilerParams(
            dimension_semantics=("parallel",),
            vmem_limit_bytes=vmem_limit,
        ),
        cost_estimate=cost,
    )(x2, enc2)
    return out.reshape(B, S, D)


if __name__ == "__main__":
    # Case 1: module-default small shapes (d_model=32 < 128 -> layout B).
    B, S, D, MAX_LEN = 2, 8, 32, 16
    x = jax.random.normal(jax.random.PRNGKey(0), (B, S, D), dtype=jnp.float32)
    encoding = make_sinusoidal_encoding(d_model=D, max_len=MAX_LEN)
    out = jax.block_until_ready(positional_encoding_forward(x, encoding))
    ref = x + encoding[:S, :][None, :, :]
    assert out.shape == (B, S, D)
    assert jnp.allclose(out, ref, atol=1e-6, rtol=1e-6)

    # Case 2: 128-aligned d_model -> layout A (2-D grid, enc DMA'd once).
    B2, S2, D2, L2 = 2, 16, 128, 32
    x2 = jax.random.normal(jax.random.PRNGKey(0), (B2, S2, D2), dtype=jnp.float32)
    enc2 = make_sinusoidal_encoding(d_model=D2, max_len=L2)
    out2 = jax.block_until_ready(positional_encoding_forward(x2, enc2))
    ref2 = x2 + enc2[:S2, :][None, :, :]
    assert out2.shape == (B2, S2, D2)
    assert jnp.allclose(out2, ref2, atol=1e-6, rtol=1e-6)

    # Case 3: bf16 activations -> layout A with 16-row sublane-packed tiles.
    B3, S3, D3, L3 = 2, 32, 256, 64
    x3 = jax.random.normal(jax.random.PRNGKey(0), (B3, S3, D3), dtype=jnp.bfloat16)
    enc3 = make_sinusoidal_encoding(d_model=D3, max_len=L3)
    out3 = jax.block_until_ready(positional_encoding_forward(x3, enc3))
    ref3 = x3 + enc3[:S3, :][None, :, :].astype(jnp.bfloat16)
    assert out3.dtype == jnp.bfloat16
    assert jnp.allclose(out3.astype(jnp.float32), ref3.astype(jnp.float32),
                        atol=2e-2, rtol=2e-2)

    # Case 4: awkward S (not a multiple of 8) -> robust layout-B fallback.
    B4, S4, D4, L4 = 3, 7, 128, 16
    x4 = jax.random.normal(jax.random.PRNGKey(0), (B4, S4, D4), dtype=jnp.float32)
    enc4 = make_sinusoidal_encoding(d_model=D4, max_len=L4)
    out4 = jax.block_until_ready(positional_encoding_forward(x4, enc4))
    ref4 = x4 + enc4[:S4, :][None, :, :]
    assert jnp.allclose(out4, ref4, atol=1e-6, rtol=1e-6)

    print("KERNEL_OK")
</pallas_src>

<mosaic_0001>
module attributes {stable_mosaic.version = 11 : i64} {
  func.func @_pos_enc_kernel(%arg0: i32, %arg1: memref<2x256xf32, #tpu.memory_space<vmem>>, %arg2: memref<1x256xf32, #tpu.memory_space<vmem>>, %arg3: memref<2x256xf32, #tpu.memory_space<vmem>>) attributes {dimension_semantics = [#tpu.dimension_semantics<parallel>], iteration_bounds = array<i64: 1>, scalar_prefetch = 0 : i64, scratch_operands = 0 : i64, tpu.core_type = #tpu.core_type<tc>, window_params = [{transform_indices = @transform_0, window_bounds = array<i64: 2, 256>}, {transform_indices = @transform_1, window_bounds = array<i64: 1, 256>}, {transform_indices = @transform_2, window_bounds = array<i64: 2, 256>}]} {
    %c0 = arith.constant 0 : index
    %c0_0 = arith.constant 0 : index
    %0 = vector.load %arg1[%c0, %c0_0] : memref<2x256xf32, #tpu.memory_space<vmem>>, vector<2x256xf32>
    %c0_1 = arith.constant 0 : index
    %c0_2 = arith.constant 0 : index
    %1 = vector.load %arg2[%c0_1, %c0_2] : memref<1x256xf32, #tpu.memory_space<vmem>>, vector<1x256xf32>
    %2 = vector.broadcast %1 : vector<1x256xf32> to vector<2x256xf32>
    %3 = arith.addf %0, %2 : vector<2x256xf32>
    %c0_3 = arith.constant 0 : index
    %c0_4 = arith.constant 0 : index
    %4 = vector.load %arg3[%c0_3, %c0_4] : memref<2x256xf32, #tpu.memory_space<vmem>>, vector<2x256xf32>
    tpu.vector_store %arg3[%c0_3, %c0_4], %3 {strides = array<i32>} : memref<2x256xf32, #tpu.memory_space<vmem>>, vector<2x256xf32>,
    return
  }
  func.func @transform_0(%arg0: i32) -> (i32, i32) {
    %c0_i32 = arith.constant 0 : i32
    %c0_i32_0 = arith.constant 0 : i32
    return %c0_i32, %arg0 : i32, i32
  }
  func.func @transform_1(%arg0: i32) -> (i32, i32) {
    %c0_i32 = arith.constant 0 : i32
    %c0_i32_0 = arith.constant 0 : i32
    return %c0_i32, %arg0 : i32, i32
  }
  func.func @transform_2(%arg0: i32) -> (i32, i32) {
    %c0_i32 = arith.constant 0 : i32
    %c0_i32_0 = arith.constant 0 : i32
    return %c0_i32, %arg0 : i32, i32
  }
}

</mosaic_0001>

<bundles_post_ra>
// kernel: tpu_custom_call.1
= control target key start
LH: loop header
LB: loop body
LE: loop exit
PB: predicated region body
PF: predicated region fallthrough
CT: control target
= control target key end

     0   :  { %7 = vsyncpa [#allocation3], 0  ;;  %s172_s0 = inlined_call_operand.hbm [shape: f32[2,256], index: 0, kind: input, shape index: {}]   ;;  %s173_s1 = inlined_call_operand.hbm [shape: f32[1,256], index: 1, kind: input, shape index: {}]   ;;  %s174_s2 = inlined_call_operand.hbm [shape: f32[2,256], index: 2, kind: output, shape index: {}]  }
   0x1   :  { %8 = vsyncpa [#allocation6], 0 }
   0x2   :  { %9 = vsyncpa [#allocation4], 0  ;;  %s144_s9 = smov [#allocation2]   ;;  %s145_s11 = smov [#allocation5]  }
   0x3   :  { %s16_s10 = sshll.u32 %s144_s9, 4  ;;  %s26_s12 = sshll.u32 %s145_s11, 4  ;;  %s17_s10 = int_to_ptr.vmem [resolvable:$true] %s16_s10  ;;  %s27_s12 = int_to_ptr.vmem [resolvable:$true] %s26_s12 }
   0x4   :  { %s86_s13 = scalar_lea.vmem %s17_s10, 64  ;;  %p91_p1 = scmp.lt.s32.totalorder %s17_s10, %s17_s10 }
   0x5   :  { %p87_p0 = scmp.ne.s32.totalorder %s17_s10, %s86_s13  ;;  %p92_p2 = scmp.lt.s32.totalorder %s86_s13, %s86_s13 }
   0x7   :  { %p93_p3 = por %p92_p2, %p91_p1 }
   0x9   :  { %p94_p4 = pnand %p93_p3, %p87_p0 }
   0xb   :  { %97 = shalt.err (!%p94_p4)
}
   0xc   :  { %19 = dma.hbm_to_vmem [thread:$0]  %s172_s0, 64, %s17_s10, [#allocation3]  }
   0xd   :  { %s106_s16 = scalar_lea.vmem %s27_s12, 32  ;;  %p111_p6 = scmp.lt.s32.totalorder %s27_s12, %s27_s12 }
   0xe   :  { %p107_p5 = scmp.ne.s32.totalorder %s27_s12, %s106_s16  ;;  %p112_p7 = scmp.lt.s32.totalorder %s106_s16, %s106_s16 }
  0x10   :  { %p113_p8 = por %p112_p7, %p111_p6 }
  0x12   :  { %p114_p9 = pnand %p113_p8, %p107_p5 }
  0x14   :  { %117 = shalt.err (!%p114_p9)
}
  0x15   :  { %29 = dma.hbm_to_vmem [thread:$0]  %s173_s1, 32, %s27_s12, [#allocation6]  }
  0x16   :  { %138 = dma.done.wait [#allocation3], 64  }
  0x17   :  { %139 = vsyncadd [#allocation3], 4294967232 }
  0x18   :  { %140 = dma.done.wait [#allocation6], 32  }
  0x19   :  { %141 = vsyncadd [#allocation6], 4294967264  ;;  %v39_v0 = vlaneseq  ;;  %v146_v1 = vmov 1983009808   ;;  %v37_v7 = vld [vmem:[#allocation5] sm:$0x3] }
  0x1a   :  { %v49_v2 = vunpack.c.l.s4 %v146_v1  ;;  %v36_v12 = vld [vmem:[#allocation2] sm:$0xf]  ;;  %s147_s0 = smov [#allocation7]  }
  0x1b   :  { %v40_v3 = vshrl.u32 %v39_v0, 7  ;;  %s64_s19 = sshll.u32 %s147_s0, 4  ;;  %s65_s19 = int_to_ptr.vmem [resolvable:$true] %s64_s19 }
  0x1c   :  { %v50_v6 = vunpack.c.0.s8 %v49_v2  ;;  %s118_s1 = scalar_lea.vmem %s65_s19, 64  ;;  %p123_p11 = scmp.lt.s32.totalorder %s65_s19, %s65_s19 }
  0x1d   :  { %v41_v4 = vsub.s32 0, %v40_v3  ;;  %v45_v5 = vsub.s32 1, %v40_v3  ;;  %p119_p10 = scmp.ne.s32.totalorder %s65_s19, %s118_s1  ;;  %p124_p12 = scmp.lt.s32.totalorder %s118_s1, %s118_s1 }
  0x1e   :  { %v53_v10 = vsub.s32 %v50_v6, %v40_v3 }
  0x1f   :  { %v42_v8 = vrot.slane %v37_v7, %v41_v4  ;;  %v46_v9 = vrot.slane %v37_v7, %v45_v5  ;;  %p125_p13 = por %p124_p12, %p123_p11 }
  0x21   :  { %v47_v11 = vcombine.low %v42_v8, %v46_v9  ;;  %p126_p0 = pnand %p125_p13, %p119_p10 }
  0x23   :  { %v54_v13 = vrot.slane %v47_v11, %v53_v10 }
  0x25   :  { %v56_v14 = vadd.f32 %v54_v13, %v36_v12 }
  0x27   :  { %57 = vst [vmem:[#allocation7] sm:$0xf] %v56_v14 }
  0x28   :  { %129 = shalt.err (!%p126_p0)
}
  0x29   :  { %67 = dma.vmem_to_hbm [thread:$0]  %s65_s19, 64, %s174_s2, [#allocation4]  }
  0x2a   :  { %142 = dma.done.wait [#allocation4], 64  }
  0x2b   :  { %143 = vsyncadd [#allocation4], 4294967232 }
  0x2c   :  { %71 = vsyncpa [#allocation3], 1 }
  0x2d   :  { %72 = vsyncpa [#allocation6], 1 }
  0x2e   :  { %73 = vsyncpa [#allocation4], 1 }

</bundles_post_ra>
